<compile_context>
chip_gen: v7x
topology: tpu7x:2x2x1
jax: 0.10.0
libtpu: 0.0.40
codegen_flags: <defaults>
</compile_context>

<pallas_src>
import functools

import jax
import jax.numpy as jnp
from jax import lax
from jax.experimental import pallas as pl
from jax.experimental.pallas import tpu as pltpu

_LANES = 128
_MAX_BLK_ROWS = 64     # 64 * 128 = 8192 rays per grid step
_NC = 2                # leading "parallel" grid axis (2 TCs on v7x; no-op on v5e/v6e)


def _round_up(x, m):
    return (x + m - 1) // m * m


def _hue_value(r, g, b):
    """H and V channels of skimage-style rgb2hsv on dense (blk_rows, 128) tiles."""
    maxc = jnp.maximum(jnp.maximum(r, g), b)
    minc = jnp.minimum(jnp.minimum(r, g), b)
    delta = maxc - minc
    zero_delta = delta == 0.0
    # One reciprocal + 3 multiplies instead of 3 divides (EUP pressure).
    # Exact (approx=False) because hue error is amplified by the steep sigmoid.
    inv = pl.reciprocal(jnp.where(zero_delta, 1.0, delta), approx=False)
    rc = (maxc - r) * inv
    gc = (maxc - g) * inv
    bc = (maxc - b) * inv
    # match skimage's assignment order (b overrides g overrides r on ties)
    h = bc - gc
    h = jnp.where(g == maxc, 2.0 + rc - bc, h)
    h = jnp.where(b == maxc, 4.0 + gc - rc, h)
    h6 = h * (1.0 / 6.0)
    h = h6 - jnp.floor(h6)                      # == (h/6) mod 1
    h = jnp.where(zero_delta, 0.0, h)
    return h, maxc


def _bg_guided_kernel(*refs, n_rays, blk_rows, steps, guided, has_pad):
    if guided:
        thr_ref, gt_ref, bg_ref, fg_ref, unc_ref, out_ref = refs
    else:
        gt_ref, bg_ref, out_ref = refs

    c = pl.program_id(0)        # core-split axis ("parallel")
    i = pl.program_id(1)        # reduction axis ("arbitrary")

    @pl.when(i == 0)
    def _():
        out_ref[...] = jnp.zeros_like(out_ref)

    # Dense (blk_rows, 128) channel tiles.
    r_gt, g_gt, b_gt = gt_ref[0], gt_ref[1], gt_ref[2]
    r_bg, g_bg, b_bg = bg_ref[0], bg_ref[1], bg_ref[2]

    third = jnp.float32(1.0 / 3.0)
    bg_mse = ((r_gt - r_bg) ** 2 + (g_gt - g_bg) ** 2 + (b_gt - b_bg) ** 2) * third

    if guided:                                   # iter > 300 branch
        thr = thr_ref[0]                         # SMEM scalar (sreg read)

        h_gt, v_gt = _hue_value(r_gt, g_gt, b_gt)
        h_bg, v_bg = _hue_value(r_bg, g_bg, b_bg)
        dh = h_gt - h_bg
        dv = v_gt - v_bg
        diff = jnp.sqrt(dh * dh + dv * dv)       # ||(H,V)_gt - (H,V)_bg||
        mask = jax.nn.sigmoid((diff - thr) * 10.0)   # /0.1 folded into *10

        r_fg, g_fg, b_fg = fg_ref[0], fg_ref[1], fg_ref[2]
        unc = unc_ref[...]
        var = unc * unc + 1e-9
        inv_var = pl.reciprocal(var, approx=True)
        fg_mse = ((r_gt - r_fg) ** 2 + (g_gt - g_fg) ** 2 + (b_gt - b_fg) ** 2) * third
        # TODO(synk): img2mse_with_uncertainty_perray is not defined in
        # extra_losses.py; using the standard per-ray Gaussian-NLL form.
        fg_loss = fg_mse * (0.5 * inv_var) + 0.5 * jnp.log(var)

        # mask_loss == 0.0 in the reference, so 0.001 * mask_loss is dropped.
        per_ray = bg_mse * (1.0 - mask) + fg_loss * mask
    else:                                        # iter <= 300 branch
        per_ray = bg_mse                         # mean over rays == img2mse

    rays_per_block = blk_rows * _LANES
    if has_pad:
        flat = c * steps + i
        tail_block = n_rays // rays_per_block    # static Python int baked in

        @pl.when(flat >= tail_block)             # only tail blocks pay the mask
        def _():
            ridx = lax.broadcasted_iota(jnp.int32, (blk_rows, _LANES), 0)
            lidx = lax.broadcasted_iota(jnp.int32, (blk_rows, _LANES), 1)
            gidx = flat * rays_per_block + ridx * _LANES + lidx
            out_ref[...] += jnp.where(gidx < n_rays, per_ray, 0.0)

        @pl.when(flat < tail_block)
        def _():
            out_ref[...] += per_ray
    else:
        out_ref[...] += per_ray


def bg_guided_loss(gt, bg_map, fg_map, fg_acc, fg_uncertainties, iteration,
                   threshold_param=-2.0, steepness=0.1):
    """Pallas implementation of BGguidedLoss.forward for flat ray batches (N, 3)."""
    del fg_acc, steepness                        # unused in the reference forward
    n = gt.shape[0]
    guided = bool(iteration > 300)               # `iter` is a static Python int

    rows = max(1, (n + _LANES - 1) // _LANES)
    blk_rows = min(_MAX_BLK_ROWS, _round_up(rows, 8))
    rows_padded = _round_up(rows, _NC * blk_rows)
    steps = rows_padded // (_NC * blk_rows)
    n_pad = rows_padded * _LANES
    pad = n_pad - n
    has_pad = pad > 0

    def _prep_rgb(x):                            # (N, 3) -> (3, rows_padded, 128)
        # TODO(synk): the (N,3)->(3,N) transpose costs one extra XLA pass over the
        # data; accepting channel-planar inputs upstream would remove it.
        x = jnp.asarray(x, jnp.float32).T
        x = jnp.pad(x, ((0, 0), (0, pad)))
        return x.reshape(3, rows_padded, _LANES)

    gt_p = _prep_rgb(gt)
    bg_p = _prep_rgb(bg_map)

    rgb_spec = pl.BlockSpec((3, blk_rows, _LANES),
                            lambda c, i: (0, c * steps + i, 0))
    out_spec = pl.BlockSpec((blk_rows, _LANES), lambda c, i: (c, 0))

    kernel = functools.partial(_bg_guided_kernel, n_rays=n, blk_rows=blk_rows,
                               steps=steps, guided=guided, has_pad=has_pad)

    if guided:
        fg_p = _prep_rgb(fg_map)
        unc = jnp.reshape(jnp.asarray(fg_uncertainties, jnp.float32), (n,))
        unc_p = jnp.pad(unc, (0, pad), constant_values=1.0).reshape(rows_padded, _LANES)
        # threshold = 1.414 * (1 - sigmoid(threshold_param))   (learnable scalar)
        thr = 1.414 * (1.0 - jax.nn.sigmoid(jnp.asarray(threshold_param, jnp.float32)))
        thr = jnp.reshape(thr, (1,))

        in_specs = [
            pl.BlockSpec(memory_space=pltpu.MemorySpace.SMEM),   # threshold scalar
            rgb_spec,                                            # gt
            rgb_spec,                                            # BG_map
            rgb_spec,                                            # FG_map
            pl.BlockSpec((blk_rows, _LANES),                     # uncertainties
                         lambda c, i: (c * steps + i, 0)),
        ]
        args = (thr, gt_p, bg_p, fg_p, unc_p)
    else:
        # warmup path: do NOT stream FG_map / uncertainties / threshold at all
        in_specs = [rgb_spec, rgb_spec]
        args = (gt_p, bg_p)

    partial_sums = pl.pallas_call(
        kernel,
        out_shape=jax.ShapeDtypeStruct((_NC * blk_rows, _LANES), jnp.float32),
        grid_spec=pl.GridSpec(
            grid=(_NC, steps),
            in_specs=in_specs,
            out_specs=out_spec,
        ),
        compiler_params=pltpu.CompilerParams(
            dimension_semantics=("parallel", "arbitrary")),
    )(*args)

    # Final cross-lane reduce + mean over rays on a tiny array, outside the kernel.
    return jnp.sum(partial_sums) / jnp.float32(n)


def _reference_loss(gt, bg, fg, unc, iteration, threshold_param=-2.0):
    """Pure-jnp reference mirroring the PyTorch forward."""
    def hv(x):
        r, g, b = x[..., 0], x[..., 1], x[..., 2]
        maxc = jnp.maximum(jnp.maximum(r, g), b)
        minc = jnp.minimum(jnp.minimum(r, g), b)
        delta = maxc - minc
        safe = jnp.where(delta == 0.0, 1.0, delta)
        rc, gc, bc = (maxc - r) / safe, (maxc - g) / safe, (maxc - b) / safe
        h = bc - gc
        h = jnp.where(g == maxc, 2.0 + rc - bc, h)
        h = jnp.where(b == maxc, 4.0 + gc - rc, h)
        h6 = h / 6.0
        h = h6 - jnp.floor(h6)
        h = jnp.where(delta == 0.0, 0.0, h)
        return h, maxc

    bg_mse = jnp.mean((gt - bg) ** 2, axis=-1)
    if iteration <= 300:
        return jnp.mean(bg_mse)
    threshold = 1.414 * (1.0 - jax.nn.sigmoid(jnp.float32(threshold_param)))
    h_gt, v_gt = hv(gt)
    h_bg, v_bg = hv(bg)
    diff = jnp.sqrt((h_gt - h_bg) ** 2 + (v_gt - v_bg) ** 2)
    mask = jax.nn.sigmoid((diff - threshold) / 0.1)
    u = jnp.reshape(unc, (-1,))
    var = u * u + 1e-9
    fg_mse = jnp.mean((gt - fg) ** 2, axis=-1) / (2.0 * var) + 0.5 * jnp.log(var)
    return jnp.mean(bg_mse * (1.0 - mask)) + jnp.mean(fg_mse * mask)


if __name__ == "__main__":
    key = jax.random.PRNGKey(0)
    k1, k2, k3, k4 = jax.random.split(key, 4)
    n_rays = 512
    gt = jax.random.uniform(k1, (n_rays, 3), jnp.float32)
    bg = jax.random.uniform(k2, (n_rays, 3), jnp.float32)
    fg = jax.random.uniform(k3, (n_rays, 3), jnp.float32)
    unc = jax.random.uniform(k4, (n_rays, 1), jnp.float32, minval=0.1, maxval=1.0)
    fg_acc = jnp.zeros((n_rays, 1), jnp.float32)   # unused by the forward pass

    loss_guided = bg_guided_loss(gt, bg, fg, fg_acc, unc, iteration=500)
    loss_warmup = bg_guided_loss(gt, bg, fg, fg_acc, unc, iteration=100)
    jax.block_until_ready((loss_guided, loss_warmup))

    ref_guided = _reference_loss(gt, bg, fg, unc, 500)
    ref_warmup = _reference_loss(gt, bg, fg, unc, 100)
    assert jnp.allclose(loss_guided, ref_guided, rtol=2e-3, atol=3e-4), (
        loss_guided, ref_guided)
    assert jnp.allclose(loss_warmup, ref_warmup, rtol=2e-3, atol=3e-4), (
        loss_warmup, ref_warmup)

    print("KERNEL_OK")
</pallas_src>

<mosaic_0001>
module attributes {stable_mosaic.version = 11 : i64} {
  func.func @_bg_guided_kernel(%arg0: i32, %arg1: i32, %arg2: memref<1xf32, #tpu.memory_space<smem>>, %arg3: memref<3x8x128xf32, #tpu.memory_space<vmem>>, %arg4: memref<3x8x128xf32, #tpu.memory_space<vmem>>, %arg5: memref<3x8x128xf32, #tpu.memory_space<vmem>>, %arg6: memref<8x128xf32, #tpu.memory_space<vmem>>, %arg7: memref<8x128xf32, #tpu.memory_space<vmem>>) attributes {dimension_semantics = [#tpu.dimension_semantics<parallel>, #tpu.dimension_semantics<arbitrary>], iteration_bounds = array<i64: 2, 1>, scalar_prefetch = 0 : i64, scratch_operands = 0 : i64, tpu.core_type = #tpu.core_type<tc>, window_params = [{transform_indices = @transform_0, window_bounds = array<i64: 1>}, {transform_indices = @transform_1, window_bounds = array<i64: 3, 8, 128>}, {transform_indices = @transform_2, window_bounds = array<i64: 3, 8, 128>}, {transform_indices = @transform_3, window_bounds = array<i64: 3, 8, 128>}, {transform_indices = @transform_4, window_bounds = array<i64: 8, 128>}, {transform_indices = @transform_5, window_bounds = array<i64: 8, 128>}]} {
    %c0_i32 = arith.constant 0 : i32
    %0 = arith.cmpi eq, %arg1, %c0_i32 : i32
    %1 = arith.extui %0 : i1 to i32
    %c0_i32_0 = arith.constant 0 : i32
    %2 = arith.cmpi ne, %1, %c0_i32_0 : i32
    scf.if %2 {
      %cst_51 = arith.constant 0.000000e+00 : f32
      %148 = vector.broadcast %cst_51 : f32 to vector<8x128xf32>
      %c0_52 = arith.constant 0 : index
      %c0_53 = arith.constant 0 : index
      %149 = vector.load %arg7[%c0_52, %c0_53] : memref<8x128xf32, #tpu.memory_space<vmem>>, vector<8x128xf32>
      tpu.vector_store %arg7[%c0_52, %c0_53], %148 {strides = array<i32>} : memref<8x128xf32, #tpu.memory_space<vmem>>, vector<8x128xf32>,
    } else {
    }
    %c0 = arith.constant 0 : index
    %c0_1 = arith.constant 0 : index
    %c0_2 = arith.constant 0 : index
    %3 = vector.load %arg3[%c0, %c0_1, %c0_2] : memref<3x8x128xf32, #tpu.memory_space<vmem>>, vector<1x8x128xf32>
    %4 = vector.shape_cast %3 : vector<1x8x128xf32> to vector<8x128xf32>
    %c1 = arith.constant 1 : index
    %c0_3 = arith.constant 0 : index
    %c0_4 = arith.constant 0 : index
    %5 = vector.load %arg3[%c1, %c0_3, %c0_4] : memref<3x8x128xf32, #tpu.memory_space<vmem>>, vector<1x8x128xf32>
    %6 = vector.shape_cast %5 : vector<1x8x128xf32> to vector<8x128xf32>
    %c2 = arith.constant 2 : index
    %c0_5 = arith.constant 0 : index
    %c0_6 = arith.constant 0 : index
    %7 = vector.load %arg3[%c2, %c0_5, %c0_6] : memref<3x8x128xf32, #tpu.memory_space<vmem>>, vector<1x8x128xf32>
    %8 = vector.shape_cast %7 : vector<1x8x128xf32> to vector<8x128xf32>
    %c0_7 = arith.constant 0 : index
    %c0_8 = arith.constant 0 : index
    %c0_9 = arith.constant 0 : index
    %9 = vector.load %arg4[%c0_7, %c0_8, %c0_9] : memref<3x8x128xf32, #tpu.memory_space<vmem>>, vector<1x8x128xf32>
    %10 = vector.shape_cast %9 : vector<1x8x128xf32> to vector<8x128xf32>
    %c1_10 = arith.constant 1 : index
    %c0_11 = arith.constant 0 : index
    %c0_12 = arith.constant 0 : index
    %11 = vector.load %arg4[%c1_10, %c0_11, %c0_12] : memref<3x8x128xf32, #tpu.memory_space<vmem>>, vector<1x8x128xf32>
    %12 = vector.shape_cast %11 : vector<1x8x128xf32> to vector<8x128xf32>
    %c2_13 = arith.constant 2 : index
    %c0_14 = arith.constant 0 : index
    %c0_15 = arith.constant 0 : index
    %13 = vector.load %arg4[%c2_13, %c0_14, %c0_15] : memref<3x8x128xf32, #tpu.memory_space<vmem>>, vector<1x8x128xf32>
    %14 = vector.shape_cast %13 : vector<1x8x128xf32> to vector<8x128xf32>
    %15 = arith.subf %4, %10 : vector<8x128xf32>
    %16 = arith.mulf %15, %15 : vector<8x128xf32>
    %17 = arith.subf %6, %12 : vector<8x128xf32>
    %18 = arith.mulf %17, %17 : vector<8x128xf32>
    %19 = arith.addf %16, %18 : vector<8x128xf32>
    %20 = arith.subf %8, %14 : vector<8x128xf32>
    %21 = arith.mulf %20, %20 : vector<8x128xf32>
    %22 = arith.addf %19, %21 : vector<8x128xf32>
    %cst = arith.constant 0.333333343 : f32
    %23 = vector.broadcast %cst : f32 to vector<8x128xf32>
    %24 = arith.mulf %22, %23 : vector<8x128xf32>
    %c0_16 = arith.constant 0 : index
    %25 = memref.load %arg2[%c0_16] : memref<1xf32, #tpu.memory_space<smem>>
    %26 = arith.maximumf %4, %6 : vector<8x128xf32>
    %27 = arith.maximumf %26, %8 : vector<8x128xf32>
    %28 = arith.minimumf %4, %6 : vector<8x128xf32>
    %29 = arith.minimumf %28, %8 : vector<8x128xf32>
    %30 = arith.subf %27, %29 : vector<8x128xf32>
    %cst_17 = arith.constant 0.000000e+00 : f32
    %31 = vector.broadcast %cst_17 : f32 to vector<8x128xf32>
    %32 = arith.cmpf oeq, %30, %31 : vector<8x128xf32>
    %cst_18 = arith.constant 1.000000e+00 : f32
    %33 = vector.broadcast %cst_18 : f32 to vector<8x128xf32>
    %34 = arith.select %32, %33, %30 : vector<8x128xi1>, vector<8x128xf32>
    %35 = tpu.reciprocal %34 : vector<8x128xf32> -> vector<8x128xf32>
    %36 = arith.subf %27, %4 : vector<8x128xf32>
    %37 = arith.mulf %36, %35 : vector<8x128xf32>
    %38 = arith.subf %27, %6 : vector<8x128xf32>
    %39 = arith.mulf %38, %35 : vector<8x128xf32>
    %40 = arith.subf %27, %8 : vector<8x128xf32>
    %41 = arith.mulf %40, %35 : vector<8x128xf32>
    %42 = arith.subf %41, %39 : vector<8x128xf32>
    %43 = arith.cmpf oeq, %6, %27 : vector<8x128xf32>
    %cst_19 = arith.constant 2.000000e+00 : f32
    %44 = vector.broadcast %cst_19 : f32 to vector<8x128xf32>
    %45 = arith.addf %44, %37 : vector<8x128xf32>
    %46 = arith.subf %45, %41 : vector<8x128xf32>
    %47 = arith.select %43, %46, %42 : vector<8x128xi1>, vector<8x128xf32>
    %48 = arith.cmpf oeq, %8, %27 : vector<8x128xf32>
    %cst_20 = arith.constant 4.000000e+00 : f32
    %49 = vector.broadcast %cst_20 : f32 to vector<8x128xf32>
    %50 = arith.addf %49, %39 : vector<8x128xf32>
    %51 = arith.subf %50, %37 : vector<8x128xf32>
    %52 = arith.select %48, %51, %47 : vector<8x128xi1>, vector<8x128xf32>
    %cst_21 = arith.constant 0.166666672 : f32
    %53 = vector.broadcast %cst_21 : f32 to vector<8x128xf32>
    %54 = arith.mulf %52, %53 : vector<8x128xf32>
    %55 = math.floor %54 : vector<8x128xf32>
    %56 = arith.subf %54, %55 : vector<8x128xf32>
    %cst_22 = arith.constant 0.000000e+00 : f32
    %57 = vector.broadcast %cst_22 : f32 to vector<8x128xf32>
    %58 = arith.select %32, %57, %56 : vector<8x128xi1>, vector<8x128xf32>
    %59 = arith.maximumf %10, %12 : vector<8x128xf32>
    %60 = arith.maximumf %59, %14 : vector<8x128xf32>
    %61 = arith.minimumf %10, %12 : vector<8x128xf32>
    %62 = arith.minimumf %61, %14 : vector<8x128xf32>
    %63 = arith.subf %60, %62 : vector<8x128xf32>
    %cst_23 = arith.constant 0.000000e+00 : f32
    %64 = vector.broadcast %cst_23 : f32 to vector<8x128xf32>
    %65 = arith.cmpf oeq, %63, %64 : vector<8x128xf32>
    %cst_24 = arith.constant 1.000000e+00 : f32
    %66 = vector.broadcast %cst_24 : f32 to vector<8x128xf32>
    %67 = arith.select %65, %66, %63 : vector<8x128xi1>, vector<8x128xf32>
    %68 = tpu.reciprocal %67 : vector<8x128xf32> -> vector<8x128xf32>
    %69 = arith.subf %60, %10 : vector<8x128xf32>
    %70 = arith.mulf %69, %68 : vector<8x128xf32>
    %71 = arith.subf %60, %12 : vector<8x128xf32>
    %72 = arith.mulf %71, %68 : vector<8x128xf32>
    %73 = arith.subf %60, %14 : vector<8x128xf32>
    %74 = arith.mulf %73, %68 : vector<8x128xf32>
    %75 = arith.subf %74, %72 : vector<8x128xf32>
    %76 = arith.cmpf oeq, %12, %60 : vector<8x128xf32>
    %cst_25 = arith.constant 2.000000e+00 : f32
    %77 = vector.broadcast %cst_25 : f32 to vector<8x128xf32>
    %78 = arith.addf %77, %70 : vector<8x128xf32>
    %79 = arith.subf %78, %74 : vector<8x128xf32>
    %80 = arith.select %76, %79, %75 : vector<8x128xi1>, vector<8x128xf32>
    %81 = arith.cmpf oeq, %14, %60 : vector<8x128xf32>
    %cst_26 = arith.constant 4.000000e+00 : f32
    %82 = vector.broadcast %cst_26 : f32 to vector<8x128xf32>
    %83 = arith.addf %82, %72 : vector<8x128xf32>
    %84 = arith.subf %83, %70 : vector<8x128xf32>
    %85 = arith.select %81, %84, %80 : vector<8x128xi1>, vector<8x128xf32>
    %cst_27 = arith.constant 0.166666672 : f32
    %86 = vector.broadcast %cst_27 : f32 to vector<8x128xf32>
    %87 = arith.mulf %85, %86 : vector<8x128xf32>
    %88 = math.floor %87 : vector<8x128xf32>
    %89 = arith.subf %87, %88 : vector<8x128xf32>
    %cst_28 = arith.constant 0.000000e+00 : f32
    %90 = vector.broadcast %cst_28 : f32 to vector<8x128xf32>
    %91 = arith.select %65, %90, %89 : vector<8x128xi1>, vector<8x128xf32>
    %92 = arith.subf %58, %91 : vector<8x128xf32>
    %93 = arith.subf %27, %60 : vector<8x128xf32>
    %94 = arith.mulf %92, %92 : vector<8x128xf32>
    %95 = arith.mulf %93, %93 : vector<8x128xf32>
    %96 = arith.addf %94, %95 : vector<8x128xf32>
    %97 = math.sqrt %96 : vector<8x128xf32>
    %98 = vector.broadcast %25 : f32 to vector<8x128xf32>
    %99 = arith.subf %97, %98 : vector<8x128xf32>
    %cst_29 = arith.constant 1.000000e+01 : f32
    %100 = vector.broadcast %cst_29 : f32 to vector<8x128xf32>
    %101 = arith.mulf %99, %100 : vector<8x128xf32>
    %102 = arith.negf %101 : vector<8x128xf32>
    %103 = math.exp %102 : vector<8x128xf32>
    %cst_30 = arith.constant 1.000000e+00 : f32
    %104 = vector.broadcast %cst_30 : f32 to vector<8x128xf32>
    %105 = arith.addf %104, %103 : vector<8x128xf32>
    %106 = arith.divf %104, %105 : vector<8x128xf32>
    %c0_31 = arith.constant 0 : index
    %c0_32 = arith.constant 0 : index
    %c0_33 = arith.constant 0 : index
    %107 = vector.load %arg5[%c0_31, %c0_32, %c0_33] : memref<3x8x128xf32, #tpu.memory_space<vmem>>, vector<1x8x128xf32>
    %108 = vector.shape_cast %107 : vector<1x8x128xf32> to vector<8x128xf32>
    %c1_34 = arith.constant 1 : index
    %c0_35 = arith.constant 0 : index
    %c0_36 = arith.constant 0 : index
    %109 = vector.load %arg5[%c1_34, %c0_35, %c0_36] : memref<3x8x128xf32, #tpu.memory_space<vmem>>, vector<1x8x128xf32>
    %110 = vector.shape_cast %109 : vector<1x8x128xf32> to vector<8x128xf32>
    %c2_37 = arith.constant 2 : index
    %c0_38 = arith.constant 0 : index
    %c0_39 = arith.constant 0 : index
    %111 = vector.load %arg5[%c2_37, %c0_38, %c0_39] : memref<3x8x128xf32, #tpu.memory_space<vmem>>, vector<1x8x128xf32>
    %112 = vector.shape_cast %111 : vector<1x8x128xf32> to vector<8x128xf32>
    %c0_40 = arith.constant 0 : index
    %c0_41 = arith.constant 0 : index
    %113 = vector.load %arg6[%c0_40, %c0_41] : memref<8x128xf32, #tpu.memory_space<vmem>>, vector<8x128xf32>
    %114 = arith.mulf %113, %113 : vector<8x128xf32>
    %cst_42 = arith.constant 9.99999971E-10 : f32
    %115 = vector.broadcast %cst_42 : f32 to vector<8x128xf32>
    %116 = arith.addf %114, %115 : vector<8x128xf32>
    %117 = tpu.reciprocal %116 {approx = true} : vector<8x128xf32> -> vector<8x128xf32>
    %118 = arith.subf %4, %108 : vector<8x128xf32>
    %119 = arith.mulf %118, %118 : vector<8x128xf32>
    %120 = arith.subf %6, %110 : vector<8x128xf32>
    %121 = arith.mulf %120, %120 : vector<8x128xf32>
    %122 = arith.addf %119, %121 : vector<8x128xf32>
    %123 = arith.subf %8, %112 : vector<8x128xf32>
    %124 = arith.mulf %123, %123 : vector<8x128xf32>
    %125 = arith.addf %122, %124 : vector<8x128xf32>
    %cst_43 = arith.constant 0.333333343 : f32
    %126 = vector.broadcast %cst_43 : f32 to vector<8x128xf32>
    %127 = arith.mulf %125, %126 : vector<8x128xf32>
    %cst_44 = arith.constant 5.000000e-01 : f32
    %128 = vector.broadcast %cst_44 : f32 to vector<8x128xf32>
    %129 = arith.mulf %128, %117 : vector<8x128xf32>
    %130 = arith.mulf %127, %129 : vector<8x128xf32>
    %131 = math.log %116 : vector<8x128xf32>
    %cst_45 = arith.constant 5.000000e-01 : f32
    %132 = vector.broadcast %cst_45 : f32 to vector<8x128xf32>
    %133 = arith.mulf %132, %131 : vector<8x128xf32>
    %134 = arith.addf %130, %133 : vector<8x128xf32>
    %cst_46 = arith.constant 1.000000e+00 : f32
    %135 = vector.broadcast %cst_46 : f32 to vector<8x128xf32>
    %136 = arith.subf %135, %106 : vector<8x128xf32>
    %137 = arith.mulf %24, %136 : vector<8x128xf32>
    %138 = arith.mulf %134, %106 : vector<8x128xf32>
    %139 = arith.addf %137, %138 : vector<8x128xf32>
    %c1_i32 = arith.constant 1 : i32
    %140 = arith.muli %arg0, %c1_i32 : i32
    %141 = arith.addi %140, %arg1 : i32
    %c0_i32_47 = arith.constant 0 : i32
    %142 = arith.cmpi sge, %141, %c0_i32_47 : i32
    %143 = arith.extui %142 : i1 to i32
    %c0_i32_48 = arith.constant 0 : i32
    %144 = arith.cmpi ne, %143, %c0_i32_48 : i32
    scf.if %144 {
      %148 = tpu.iota {dimensions = array<i32: 0>} : vector<8x128xi32>
      %149 = tpu.iota {dimensions = array<i32: 1>} : vector<8x128xi32>
      %c1024_i32 = arith.constant 1024 : i32
      %150 = arith.muli %141, %c1024_i32 : i32
      %c128_i32 = arith.constant 128 : i32
      %151 = vector.broadcast %c128_i32 : i32 to vector<8x128xi32>
      %152 = arith.muli %148, %151 : vector<8x128xi32>
      %153 = vector.broadcast %150 : i32 to vector<8x128xi32>
      %154 = arith.addi %153, %152 : vector<8x128xi32>
      %155 = arith.addi %154, %149 : vector<8x128xi32>
      %c0_51 = arith.constant 0 : index
      %c0_52 = arith.constant 0 : index
      %156 = vector.load %arg7[%c0_51, %c0_52] : memref<8x128xf32, #tpu.memory_space<vmem>>, vector<8x128xf32>
      %c512_i32 = arith.constant 512 : i32
      %157 = vector.broadcast %c512_i32 : i32 to vector<8x128xi32>
      %158 = arith.cmpi slt, %155, %157 : vector<8x128xi32>
      %cst_53 = arith.constant 0.000000e+00 : f32
      %159 = vector.broadcast %cst_53 : f32 to vector<8x128xf32>
      %160 = arith.select %158, %139, %159 : vector<8x128xi1>, vector<8x128xf32>
      %161 = arith.addf %156, %160 : vector<8x128xf32>
      %c0_54 = arith.constant 0 : index
      %c0_55 = arith.constant 0 : index
      %162 = vector.load %arg7[%c0_54, %c0_55] : memref<8x128xf32, #tpu.memory_space<vmem>>, vector<8x128xf32>
      tpu.vector_store %arg7[%c0_54, %c0_55], %161 {strides = array<i32>} : memref<8x128xf32, #tpu.memory_space<vmem>>, vector<8x128xf32>,
    } else {
    }
    %c0_i32_49 = arith.constant 0 : i32
    %145 = arith.cmpi slt, %141, %c0_i32_49 : i32
    %146 = arith.extui %145 : i1 to i32
    %c0_i32_50 = arith.constant 0 : i32
    %147 = arith.cmpi ne, %146, %c0_i32_50 : i32
    scf.if %147 {
      %c0_51 = arith.constant 0 : index
      %c0_52 = arith.constant 0 : index
      %148 = vector.load %arg7[%c0_51, %c0_52] : memref<8x128xf32, #tpu.memory_space<vmem>>, vector<8x128xf32>
      %149 = arith.addf %148, %139 : vector<8x128xf32>
      %c0_53 = arith.constant 0 : index
      %c0_54 = arith.constant 0 : index
      %150 = vector.load %arg7[%c0_53, %c0_54] : memref<8x128xf32, #tpu.memory_space<vmem>>, vector<8x128xf32>
      tpu.vector_store %arg7[%c0_53, %c0_54], %149 {strides = array<i32>} : memref<8x128xf32, #tpu.memory_space<vmem>>, vector<8x128xf32>,
    } else {
    }
    return
  }
  func.func @transform_0(%arg0: i32, %arg1: i32) -> i32 {
    %c0_i32 = arith.constant 0 : i32
    %c0_i32_0 = arith.constant 0 : i32
    return %c0_i32 : i32
  }
  func.func @transform_1(%arg0: i32, %arg1: i32) -> (i32, i32, i32) {
    %c1_i32 = arith.constant 1 : i32
    %0 = arith.muli %arg0, %c1_i32 : i32
    %1 = arith.addi %0, %arg1 : i32
    %c0_i32 = arith.constant 0 : i32
    %c0_i32_0 = arith.constant 0 : i32
    %c0_i32_1 = arith.constant 0 : i32
    return %c0_i32, %1, %c0_i32_0 : i32, i32, i32
  }
  func.func @transform_2(%arg0: i32, %arg1: i32) -> (i32, i32, i32) {
    %c1_i32 = arith.constant 1 : i32
    %0 = arith.muli %arg0, %c1_i32 : i32
    %1 = arith.addi %0, %arg1 : i32
    %c0_i32 = arith.constant 0 : i32
    %c0_i32_0 = arith.constant 0 : i32
    %c0_i32_1 = arith.constant 0 : i32
    return %c0_i32, %1, %c0_i32_0 : i32, i32, i32
  }
  func.func @transform_3(%arg0: i32, %arg1: i32) -> (i32, i32, i32) {
    %c1_i32 = arith.constant 1 : i32
    %0 = arith.muli %arg0, %c1_i32 : i32
    %1 = arith.addi %0, %arg1 : i32
    %c0_i32 = arith.constant 0 : i32
    %c0_i32_0 = arith.constant 0 : i32
    %c0_i32_1 = arith.constant 0 : i32
    return %c0_i32, %1, %c0_i32_0 : i32, i32, i32
  }
  func.func @transform_4(%arg0: i32, %arg1: i32) -> (i32, i32) {
    %c1_i32 = arith.constant 1 : i32
    %0 = arith.muli %arg0, %c1_i32 : i32
    %1 = arith.addi %0, %arg1 : i32
    %c0_i32 = arith.constant 0 : i32
    %c0_i32_0 = arith.constant 0 : i32
    return %1, %c0_i32 : i32, i32
  }
  func.func @transform_5(%arg0: i32, %arg1: i32) -> (i32, i32) {
    %c0_i32 = arith.constant 0 : i32
    %c0_i32_0 = arith.constant 0 : i32
    return %arg0, %c0_i32 : i32, i32
  }
}

</mosaic_0001>

<bundles_post_ra>
// kernel: tpu_custom_call.1
= control target key start
LH: loop header
LB: loop body
LE: loop exit
PB: predicated region body
PF: predicated region fallthrough
CT: control target
= control target key end

     0   :  { %s1444_s0 = inlined_call_operand.<no memory space> [shape: f32[1], index: 0, kind: input, shape index: {}]   ;;  %s1445_s1 = inlined_call_operand.hbm [shape: f32[3,16,128], index: 1, kind: input, shape index: {}]   ;;  %s1446_s2 = inlined_call_operand.hbm [shape: f32[3,16,128], index: 2, kind: input, shape index: {}]   ;;  %s1447_s3 = inlined_call_operand.hbm [shape: f32[3,16,128], index: 3, kind: input, shape index: {}]   ;;  %s1448_s4 = inlined_call_operand.hbm [shape: f32[16,128], index: 4, kind: input, shape index: {}]   ;;  %s1449_s5 = inlined_call_operand.hbm [shape: f32[16,128], index: 5, kind: output, shape index: {}]  }
   0x1   :  { %1462 = sst [smem:[#allocation20_spill]] %s1445_s1 }
   0x2   :  { %1463 = sst [smem:[#allocation21_spill]] %s1446_s2 }
   0x3   :  { %10 = sst [smem:[#allocation2]] %s1444_s0 }
   0x4   :  { %11 = vsyncpa [#allocation4], 0 }
   0x5   :  { %13 = vsyncpa [#allocation4 + $0x1], 0 }
   0x6   :  { %14 = vsyncpa [#allocation7], 0 }
   0x7   :  { %16 = vsyncpa [#allocation7 + $0x1], 0 }
   0x8   :  { %17 = vsyncpa [#allocation10], 0 }
   0x9   :  { %19 = vsyncpa [#allocation10 + $0x1], 0 }
   0xa   :  { %20 = vsyncpa [#allocation5], 0 }
   0xb   :  { %22 = vsyncpa [#allocation5 + $0x1], 0  ;;  %s1078_s20 = smov 0   ;;  %s1080_s21 = smov 0  }
   0xc   :  { %s1082_s22 = smov 0   ;;  %s1084_s23 = smov 0  }
   0xd   :  { %s1086_s24 = smov 0   ;;  %s1088_s25 = smov 0  }
   0xe LB: > { %1464 = sst [smem:[#allocation16_spill]] %s1022_s22  ;;  %s1109_s0 = sadd.s32 4294967295, %s1034_s25   ;;  %s1034_s25 = sphi %s1088_s25, %s28_s25   ;;  %s1030_s24 = sphi %s1086_s24, %s1490_s24   ;;  %s1026_s23 = sphi %s1084_s23, %s1489_s23   ;;  %s1022_s22 = sphi %s1082_s22, %s1493_s22   ;;  %s1018_s21 = sphi %s1080_s21, %s1492_s21   ;;  %s1014_s20 = sphi %s1078_s20, %s1491_s20  }
   0xf   : > { %1465 = sst [smem:[#allocation17_spill]] %s1030_s24  ;;  %s700_s26 = sadd.s32 4294967294, %s1034_s25  }
  0x10   : > { %s40_s27 = sadd.s32 1, %s1030_s24  ;;  %s70_s28 = sadd.s32 1, %s1022_s22 }
  0x11   : > { %p42_p0 = scmp.ge.s32.totalorder %s40_s27, 2  ;;  %p77_p1 = scmp.ne.s32.totalorder %s1022_s22, %s1018_s21 }
  0x12   : > { %p78_p2 = scmp.eq.s32.totalorder %s1034_s25, 0  ;;  %p83_p3 = scmp.ne.s32.totalorder %s1018_s21, %s1014_s20 }
  0x13   : > { %s1495_s27 = smov (%p42_p0, %s40_s27), 0  ;;  %p84_p5 = scmp.eq.s32.totalorder %s1109_s0, 0 }
  0x14   : > { %1466 = sst [smem:[#allocation18_spill]] %s1495_s27  ;;  %p1121_p4 = por %p78_p2, %p77_p1 }
  0x15   : > { %s67_s30 = ssub.s32 %s1030_s24, %s1495_s27  ;;  %p191_p6 = scmp.eq.s32.totalorder %s1109_s0, 1 }
  0x16   : > { %p68_p7 = scmp.eq.s32.totalorder %s67_s30, 0  ;;  %p1129_p8 = por %p84_p5, %p83_p3 }
  0x17   : > { %p1133_p9 = por %p191_p6, %p77_p1  ;;  %p197_p10 = scmp.eq.s32.totalorder %s700_s26, 1 }
  0x18   : > { %s1468_s6 = scalar_select %p1129_p8, 1, 0 }
  0x19   : > { %s1469_s7 = scalar_select %p1133_p9, 1, 0 }
  0x1a   : > { %s1138_s8 = scalar_select %p68_p7, %s1022_s22, %s70_s28  }
  0x1b   : > { %p1140_p11 = por %p197_p10, %p83_p3  ;;  %p756_p13 = scmp.lt.s32.totalorder %s1034_s25, 2 }
  0x1c   : > { %1470 = sst [smem:[#allocation19_spill]] %s1138_s8  ;;  %s1147_s10 = sand.u32 1, %s1022_s22  }
  0x1d   : > { %s1471_s9 = scalar_select %p1140_p11, 1, 0 }
  0x1e   : > { %s1150_s11 = smul.u32 24, %s1147_s10  ;;  %s1153_s12 = sshll.u32 %s1030_s24, 7 }
  0x1f   : > { %p1157_p0 = pnand %p756_p13, %p1121_p4  ;;  %s241_s14 = sand.u32 1, %s1034_s25  }
  0x20   : > { %s1473_s2 = sld [smem:[#allocation21_spill]]  ;;  %s245_s18 = scalar_lea.vmem [#allocation6], %s1150_s11 }
  0x21   : > { %s1472_s13 = scalar_select %p1157_p0, 1, 0 }
  0x22   : > { %s252_s19 = sshll.u32 %s245_s18, 4  ;;  %s1172_s26 = scalar_lea.sflag [#allocation7], %s241_s14  ;;  %s1169_s19 = int_to_ptr.vmem [resolvable:$true] %s252_s19 }
  0x23   : > { %p1178_p3 = pneg %p1157_p0 }
  0x26   : > { %s1166_s17 = scalar_lea.hbm %s1473_s2, %s1153_s12  ;;  %s829_s16 = scalar_lea.hbm %s1473_s2, 768 }
  0x27   : > { %s824_s28 = scalar_lea.hbm %s1166_s17, 384  ;;  %p830_p6 = scmp.lt.u32.totalorder %s1166_s17, %s1473_s2 }
  0x28   : > { %p825_p2 = scmp.ne.s32.totalorder %s1166_s17, %s824_s28  ;;  %p831_p7 = scmp.lt.u32.totalorder %s829_s16, %s824_s28 }
  0x29   : > { %p833_p13 = scmp.lt.u32.totalorder %s824_s28, %s1166_s17 }
  0x2a   : > { %p827_p4 = pnand %p1178_p3, %p825_p2  ;;  %p832_p10 = por %p831_p7, %p830_p6 }
  0x2c   : > { %p828_p5 = pneg %p827_p4  ;;  %p834_p12 = por %p833_p13, %p832_p10 }
  0x2e   : > { %p835_p1 = pnand %p834_p12, %p828_p5 }
  0x30   : > { %838 = shalt.err (!%p835_p1)
}
  0x31   : > { %s839_s14 = scalar_lea.vmem %s1169_s19, 384  ;;  %s1036_s30 = smov [#allocation6]  }
  0x32   : > { %p840_p2 = scmp.ne.s32.totalorder %s1169_s19, %s839_s14  ;;  %s844_s15 = sshll.u32 %s1036_s30, 4  ;;  %s845_s15 = int_to_ptr.vmem [resolvable:$false] %s844_s15 }
  0x33   : > { %s846_s27 = scalar_lea.vmem %s845_s15, 768  ;;  %p847_p9 = scmp.lt.s32.totalorder %s1169_s19, %s845_s15 }
  0x34   : > { %p842_p4 = pnand %p840_p2, %p1178_p3  ;;  %p848_p8 = scmp.lt.s32.totalorder %s846_s27, %s839_s14 }
  0x36   : > { %p843_p11 = pneg %p842_p4  ;;  %p849_p6 = por %p848_p8, %p847_p9 }
  0x38   : > { %p850_p7 = pnand %p849_p6, %p843_p11 }
  0x3a   : > { %853 = shalt.err (!%p850_p7)
}
  0x3b   : > { %s1454_s28 = smov 256   ;;  %s1456_s16 = smov 128  }
  0x3c   : > { %s1458_s18 = smov 8   ;;  %p300_p8 = scmp.lt.s32.totalorder %s1034_s25, 3 }
  0x3d   : > { %745 = dma.hbm_to_vmem [thread:$0]  (!%p1157_p0), %s1166_s17, 384, %s1169_s19, %s1172_s26, %s1454_s28, %s1456_s16, %s1458_s18  }
  0x3e   : > { %p1475_p9 = scmp.ge.s32.totalorder %s1034_s25, 1  ;;  %s1477_s1 = sld [smem:[#allocation20_spill]] }
  0x3f   : > { %s224_s2 = scalar_lea.vmem [#allocation3], %s1150_s11  ;;  %s221_s17 = scalar_lea.sflag [#allocation4], %s1147_s10 }
  0x40   : > { %p1208_p11 = pnand %p1475_p9, %p300_p8  ;;  %s231_s24 = sshll.u32 %s224_s2, 4  ;;  %s1219_s24 = int_to_ptr.vmem [resolvable:$true] %s231_s24 }
  0x42   : > { %s1476_s14 = scalar_select %p1208_p11, 1, 0 }
  0x44   : > { %s1216_s27 = scalar_lea.hbm %s1477_s1, %s1153_s12  ;;  %s859_s30 = scalar_lea.hbm %s1477_s1, 768 }
  0x45   : > { %s854_s19 = scalar_lea.hbm %s1216_s27, 384  ;;  %p860_p10 = scmp.lt.u32.totalorder %s1216_s27, %s1477_s1 }
  0x46   : > { %p855_p12 = scmp.ne.s32.totalorder %s1216_s27, %s854_s19  ;;  %p861_p13 = scmp.lt.u32.totalorder %s859_s30, %s854_s19 }
  0x47   : > { %p863_p4 = scmp.lt.u32.totalorder %s854_s19, %s1216_s27 }
  0x48   : > { %p857_p1 = pnand %p855_p12, %p1178_p3  ;;  %p862_p2 = por %p861_p13, %p860_p10 }
  0x4a   : > { %p858_p5 = pneg %p857_p1  ;;  %p864_p6 = por %p863_p4, %p862_p2 }
  0x4c   : > { %p865_p7 = pnand %p864_p6, %p858_p5 }
  0x4e   : > { %868 = shalt.err (!%p865_p7)
}
  0x4f   : > { %s869_s2 = scalar_lea.vmem %s1219_s24, 384  ;;  %s1040_s28 = smov [#allocation3]  }
  0x50   : > { %p870_p8 = scmp.ne.s32.totalorder %s1219_s24, %s869_s2  ;;  %s874_s16 = sshll.u32 %s1040_s28, 4  ;;  %s875_s16 = int_to_ptr.vmem [resolvable:$false] %s874_s16 }
  0x51   : > { %s876_s18 = scalar_lea.vmem %s875_s16, 768  ;;  %p877_p1 = scmp.lt.s32.totalorder %s1219_s24, %s875_s16 }
  0x52   : > { %p872_p9 = pnand %p870_p8, %p1178_p3  ;;  %p878_p11 = scmp.lt.s32.totalorder %s876_s18, %s869_s2 }
  0x54   : > { %p873_p12 = pneg %p872_p9  ;;  %p879_p10 = por %p878_p11, %p877_p1 }
  0x56   : > { %p880_p13 = pnand %p879_p10, %p873_p12 }
  0x58   : > { %883 = shalt.err (!%p880_p13)
}
  0x59   : > { %s1478_s19 = smov 8   ;;  %s1479_s30 = smov 128  }
  0x5a   : > { %s1480_s15 = smov 256   ;;  %s1252_s2 = scalar_lea.hbm %s1447_s3, %s1153_s12 }
  0x5b   : > { %742 = dma.hbm_to_vmem [thread:$0]  (!%p1157_p0), %s1216_s27, 384, %s1219_s24, %s221_s17, %s1480_s15, %s1479_s30, %s1478_s19  }
  0x5c   : > { %s266_s16 = scalar_lea.vmem [#allocation8], %s1150_s11  ;;  %s884_s8 = scalar_lea.hbm %s1252_s2, 384 }
  0x5d   : > { %s273_s18 = sshll.u32 %s266_s16, 4  ;;  %p885_p11 = scmp.ne.s32.totalorder %s1252_s2, %s884_s8  ;;  %s1255_s18 = int_to_ptr.vmem [resolvable:$true] %s273_s18 }
  0x5e   : > { %s889_s27 = scalar_lea.hbm %s1447_s3, 768  ;;  %p890_p4 = scmp.lt.u32.totalorder %s1252_s2, %s1447_s3 }
  0x5f   : > { %p887_p5 = pnand %p885_p11, %p1178_p3  ;;  %p891_p6 = scmp.lt.u32.totalorder %s889_s27, %s884_s8 }
  0x60   : > { %p893_p8 = scmp.lt.u32.totalorder %s884_s8, %s1252_s2 }
  0x61   : > { %p888_p2 = pneg %p887_p5  ;;  %p892_p7 = por %p891_p6, %p890_p4 }
  0x63   : > { %p894_p9 = por %p893_p8, %p892_p7 }
  0x65   : > { %p895_p12 = pnand %p894_p9, %p888_p2 }
  0x67   : > { %898 = shalt.err (!%p895_p12)
}
  0x68   : > { %s899_s11 = scalar_lea.vmem %s1255_s18, 384  ;;  %s1041_s22 = smov [#allocation8]  }
  0x69   : > { %p900_p1 = scmp.ne.s32.totalorder %s1255_s18, %s899_s11  ;;  %s904_s28 = sshll.u32 %s1041_s22, 4  ;;  %s905_s28 = int_to_ptr.vmem [resolvable:$false] %s904_s28 }
  0x6a   : > { %s906_s16 = scalar_lea.vmem %s905_s28, 768  ;;  %p907_p11 = scmp.lt.s32.totalorder %s1255_s18, %s905_s28 }
  0x6b   : > { %p902_p10 = pnand %p900_p1, %p1178_p3  ;;  %p908_p5 = scmp.lt.s32.totalorder %s906_s16, %s899_s11 }
  0x6d   : > { %p903_p13 = pneg %p902_p10  ;;  %p909_p4 = por %p908_p5, %p907_p11 }
  0x6f   : > { %p910_p6 = pnand %p909_p4, %p903_p13 }
  0x71   : > { %913 = shalt.err (!%p910_p6)
}
  0x72   : > { %748 = dma.hbm_to_vmem [thread:$0]  (!%p1157_p0), %s1252_s2, 384, %s1255_s18, %s1172_s26, %s1480_s15, %s1479_s30, %s1478_s19  }
  0x73   : > { %s706_s8 = sshll.u32 %s1147_s10, 3  ;;  %s1287_s1 = scalar_lea.hbm %s1448_s4, %s1153_s12 }
  0x74   : > { %s287_s17 = scalar_lea.vmem [#allocation9], %s706_s8  ;;  %s284_s22 = scalar_lea.sflag [#allocation10], %s1147_s10 }
  0x75   : > { %s295_s11 = sshll.u32 %s287_s17, 4  ;;  %s914_s28 = scalar_lea.hbm %s1287_s1, 128  ;;  %s296_s11 = int_to_ptr.vmem [resolvable:$true] %s295_s11 }
  0x76   : > { %p915_p2 = scmp.ne.s32.totalorder %s1287_s1, %s914_s28  ;;  %s919_s30 = scalar_lea.hbm %s1448_s4, 256 }
  0x77   : > { %p920_p9 = scmp.lt.u32.totalorder %s1287_s1, %s1448_s4  ;;  %p921_p12 = scmp.lt.u32.totalorder %s919_s30, %s914_s28 }
  0x78   : > { %p917_p7 = pnand %p915_p2, %p1178_p3  ;;  %p923_p10 = scmp.lt.u32.totalorder %s914_s28, %s1287_s1 }
  0x79   : > { %p922_p1 = por %p921_p12, %p920_p9 }
  0x7a   : > { %p918_p8 = pneg %p917_p7 }
  0x7b   : > { %p924_p13 = por %p923_p10, %p922_p1 }
  0x7d   : > { %p925_p11 = pnand %p924_p13, %p918_p8 }
  0x7f   : > { %928 = shalt.err (!%p925_p11)
}
  0x80   : > { %s929_s10 = scalar_lea.vmem %s296_s11, 128  ;;  %s1042_s2 = smov [#allocation9]  }
  0x81   : > { %p930_p5 = scmp.ne.s32.totalorder %s296_s11, %s929_s10  ;;  %s934_s18 = sshll.u32 %s1042_s2, 4  ;;  %s935_s18 = int_to_ptr.vmem [resolvable:$false] %s934_s18 }
  0x82   : > { %s936_s16 = scalar_lea.vmem %s935_s18, 256  ;;  %p937_p2 = scmp.lt.s32.totalorder %s296_s11, %s935_s18 }
  0x83   : > { %p932_p4 = pnand %p930_p5, %p1178_p3  ;;  %p938_p7 = scmp.lt.s32.totalorder %s936_s16, %s929_s10 }
  0x85   : > { %p933_p6 = pneg %p932_p4  ;;  %p939_p0 = por %p938_p7, %p937_p2 }
  0x87   : > { %p940_p9 = pnand %p939_p0, %p933_p6 }
  0x89   : > { %943 = shalt.err (!%p940_p9)
}
  0x8a   : > { %p1481_p12 = scmp.ne.s32.totalorder %s1472_s13, 0  ;;  %p1482_p8 = scmp.ne.s32.totalorder %s1476_s14, 0 }
  0x8b   : > { %s1310_s29 = sand.u32 (!%p1482_p8), 1, %s1018_s21   ;;  %p1483_p3 = scmp.ne.s32.totalorder (!%p1482_p8), %s1468_s6, 0 }
  0x8c   : > { %751 = dma.hbm_to_vmem [thread:$0]  (!%p1481_p12), %s1287_s1, 128, %s296_s11, %s284_s22  }
  0x8d   : > { %304 = sbr.rel (%p1482_p8) target bundleno = 289 (0x121), region = 40  ;;  %s307_s24 = scalar_lea.sflag (!%p1482_p8), [#allocation4], %s1310_s29 }
  0x8e   : > { %s728_s8 = smul.u32 (!%p1482_p8), 24, %s1310_s29 }
  0x90   : > { %s310_s27 = scalar_lea.vmem (!%p1482_p8), [#allocation3], %s728_s8 }
  0x94   : > { %997 = dma.done.wait (%p1483_p3), %s307_s24, 384  }
  0x95   : > { %999 = vsyncadd (%p1483_p3), %s307_s24, 4294966912  ;;  %s315_s13 = sand.u32 1, %s1109_s0   ;;  %s319_s14 = scalar_lea.vmem [#allocation6], %s728_s8 }
  0x96   : > { %s316_s1 = scalar_lea.sflag [#allocation7], %s315_s13 }
  0x97   : > { %1001 = dma.done.wait (%p1483_p3), %s316_s1, 768  }
  0x98   : > { %1003 = vsyncadd (%p1483_p3), %s316_s1, 4294966528  ;;  %s709_s17 = sshll.u32 %s1310_s29, 3  ;;  %s1324_s11 = scalar_lea.vmem [#allocation8], %s728_s8 }
  0x99   : > { %s334_s22 = scalar_lea.sflag [#allocation10], %s1310_s29  ;;  %s1327_s28 = scalar_lea.vmem [#allocation9], %s709_s17 }
  0x9a   : > { %1005 = dma.done.wait (%p1483_p3), %s334_s22, 128  }
  0x9b   : > { %1007 = vsyncadd (%p1483_p3), %s334_s22, 4294967168  ;;  %s1333_s0 = scalar_lea.vmem [#allocation11], %s709_s17  ;;  %v1043_v0 = vmov 0.0   ;;  %v388_v1 = vld [vmem:[%s310_s27] sm:$0xff]  ;;  %v1336_v2 = vld [vmem:[%s310_s27 + $0x8] sm:$0xff]  ;;  %s407_s6 = sld [smem:[#allocation2]] }
  0x9c   : > { %387 = vst [vmem:[%s1333_s0] sm:$0xff] %v1043_v0  ;;  %v1338_v3 = vld [vmem:[%s310_s27 + $0x10] sm:$0xff]  ;;  %v1340_v5 = vld [vmem:[%s319_s14 + $0x8] sm:$0xff]  ;;  %v1342_v6 = vld [vmem:[%s319_s14 + $0x10] sm:$0xff]  ;;  %v408_v7 = vmax.f32 %v388_v1, %v1336_v2  ;;  %v410_v8 = vmin.f32 %v388_v1, %v1336_v2  ;;  %p718_p0 = scmp.lt.s32.totalorder %s1026_s23, 0 }
  0x9d   : > { %v393_v4 = vld [vmem:[%s319_s14] sm:$0xff]  ;;  %v400_v10 = vsub.f32 %v1336_v2, %v1340_v5  ;;  %v403_v11 = vsub.f32 %v1338_v3, %v1342_v6  ;;  %v483_v16 = vld [vmem:[%s1324_s11] sm:$0xff]  ;;  %v716_v25 = vld [vmem:[%s1324_s11 + $0x8] sm:$0xff]  ;;  %s719_s26 = sshll.u32 (!%p718_p0), %s1026_s23, 10 }
  0x9e   : > { %v398_v9 = vsub.f32 %v388_v1, %v393_v4  ;;  %v435_v12 = vmax.f32 %v393_v4, %v1340_v5  ;;  %v1352_v13 = vmax.f32 %v408_v7, %v1338_v3  ;;  %v411_v14 = vmin.f32 %v410_v8, %v1338_v3  ;;  %v717_v29 = vld [vmem:[%s1324_s11 + $0x10] sm:$0xff] }
  0x9f   : > { %v437_v15 = vmin.f32 %v393_v4, %v1340_v5  ;;  %v401_v18 = vmul.f32 %v400_v10, %v400_v10  ;;  %v404_v19 = vmul.f32 %v403_v11, %v403_v11  ;;  %v492_v24 = vsub.f32 %v388_v1, %v483_v16  ;;  %v488_v16 = vld [vmem:[%s1327_s28] sm:$0xff] }
  0xa0   : > { %v399_v17 = vmul.f32 %v398_v9, %v398_v9  ;;  %v436_v20 = vmax.f32 %v435_v12, %v1342_v6  ;;  %v412_v21 = vsub.f32 %v1352_v13, %v411_v14  ;;  %v494_v31 = vsub.f32 %v1336_v2, %v716_v25 }
  0xa1   : > { %v438_v23 = vmin.f32 %v437_v15, %v1342_v6  ;;  %v493_v30 = vmul.f32 %v492_v24, %v492_v24  ;;  %v497_v33 = vsub.f32 %v1338_v3, %v717_v29  ;;  %v416_v37 = vsub.f32 %v1352_v13, %v388_v1 }
  0xa2   : > { %v402_v22 = vadd.f32 %v401_v18, %v399_v17  ;;  %vm413_vm0 = vcmp.eq.f32.partialorder %v412_v21, 0.0  ;;  %v495_v34 = vmul.f32 %v494_v31, %v494_v31  ;;  %v418_v38 = vsub.f32 %v1352_v13, %v1336_v2 }
  0xa3   : > { %v414_v27 = vsel %vm413_vm0, 1.0, %v412_v21  ;;  %v439_v28 = vsub.f32 %v436_v20, %v438_v23  ;;  %v498_v35 = vmul.f32 %v497_v33, %v497_v33  ;;  %v420_v39 = vsub.f32 %v1352_v13, %v1338_v3 }
  0xa4   : > { %v1361_v26 = vadd.f32 %v404_v19, %v402_v22  ;;  %810 = vrcp.f32 %v414_v27  ;;  %v496_v36 = vadd.f32 %v495_v34, %v493_v30  ;;  %v443_v42 = vsub.f32 %v436_v20, %v393_v4 }
  0xa5   : > { %vm440_vm1 = vcmp.eq.f32.partialorder %v439_v28, 0.0  ;;  %v445_v43 = vsub.f32 %v436_v20, %v1340_v5  ;;  %v447_v44 = vsub.f32 %v436_v20, %v1342_v6  ;;  %vm423_vm2 = vcmp.eq.f32.partialorder %v1336_v2, %v1352_v13 }
  0xa6   : > { %v441_v32 = vsel %vm440_vm1, 1.0, %v439_v28  ;;  %v1373_v40 = vadd.f32 %v498_v35, %v496_v36  ;;  %vm427_vm3 = vcmp.eq.f32.partialorder %v1338_v3, %v1352_v13  ;;  %vm450_vm4 = vcmp.eq.f32.partialorder %v1340_v5, %v436_v20 }
  0xa7   : > { %812 = vrcp.f32 %v441_v32  ;;  %vm454_vm5 = vcmp.eq.f32.partialorder %v1342_v6, %v436_v20  ;;  %v463_v9 = vsub.f32 %v1352_v13, %v436_v20  ;;  %v489_v22 = vmul.f32 %v488_v16, %v488_v16 }
  0xa8   : > { %v474_v23 = vstv %s407_s6  ;;  %v500_v32 = vmul.f32 0.33333334, %v1373_v40 }
  0xa9   : > { %v465_v14 = vmul.f32 %v463_v9, %v463_v9  ;;  %v490_v24 = vadd.f32 1e-09, %v489_v22 }
  0xae   : > { %v811_v41 = vpop.eup %810 }
  0xaf   : > { %v417_v45 = vmul.f32 %v811_v41, %v416_v37  ;;  %v419_v46 = vmul.f32 %v811_v41, %v418_v38  ;;  %v421_v47 = vmul.f32 %v811_v41, %v420_v39  ;;  %v406_v38 = vmul.f32 0.33333334, %v1361_v26  ;;  %v525_v26 = vld [vmem:[%s1333_s0] sm:$0xff] (!%p718_p0) }
  0xb1   : > { %v813_v48 = vpop.eup %812  ;;  %v422_v49 = vsub.f32 %v421_v47, %v419_v46  ;;  %v424_v50 = vadd.f32 2.0, %v417_v45  ;;  %v428_v51 = vadd.f32 4.0, %v419_v46  ;;  %v522_v46 = vstv (!%p718_p0), %s719_s26 }
  0xb2   : > { %v444_v52 = vmul.f32 %v813_v48, %v443_v42  ;;  %v446_v53 = vmul.f32 %v813_v48, %v445_v43  ;;  %v448_v54 = vmul.f32 %v813_v48, %v447_v44 }
  0xb3   : > { %v425_v55 = vsub.f32 %v424_v50, %v421_v47  ;;  %v429_v56 = vsub.f32 %v428_v51, %v417_v45  ;;  %v516_v45 = vlaneseq (!%p718_p0) }
  0xb4   : > { %v449_v57 = vsub.f32 %v448_v54, %v446_v53  ;;  %v451_v58 = vadd.f32 2.0, %v444_v52  ;;  %v455_v59 = vadd.f32 4.0, %v446_v53 }
  0xb5   : > { %v426_v60 = vsel %vm423_vm2, %v425_v55, %v422_v49  ;;  %v517_v40 = vshrl.u32 (!%p718_p0), %v516_v45, 7  ;;  %v519_v47 = vand.u32 (!%p718_p0), 127, %v516_v45 }
  0xb6   : > { %v430_v61 = vsel %vm427_vm3, %v429_v56, %v426_v60  ;;  %v452_v62 = vsub.f32 %v451_v58, %v448_v54  ;;  %v456_v63 = vsub.f32 %v455_v59, %v444_v52 }
  0xb7   : > { %v431_v0 = vmul.f32 0.16666667, %v430_v61  ;;  %v521_v48 = vmul.u32 (!%p718_p0), 128, %v517_v40 }
  0xb8   : > { %v453_v1 = vsel %vm450_vm4, %v452_v62, %v449_v57 }
  0xb9   : > { %v432_v2 = vfloor.f32 %v431_v0  ;;  %v457_v4 = vsel %vm454_vm5, %v456_v63, %v453_v1  ;;  %v523_v49 = vadd.s32 (!%p718_p0), %v522_v46, %v521_v48 }
  0xba   : > { %v458_v7 = vmul.f32 0.16666667, %v457_v4 }
  0xbb   : > { %v433_v8 = vsub.f32 %v431_v0, %v432_v2  ;;  %v524_v50 = vadd.s32 (!%p718_p0), %v523_v49, %v519_v47 }
  0xbc   : > { %v459_v3 = vfloor.f32 %v458_v7 }
  0xbd   : > { %v434_v10 = vsel %vm413_vm0, 0.0, %v433_v8  ;;  %vm526_vm8 = vcmp.lt.s32.totalorder (!%p718_p0), %v524_v50, 512 }
  0xbe   : > { %v460_v11 = vsub.f32 %v458_v7, %v459_v3 }
  0xc0   : > { %v461_v5 = vsel %vm440_vm1, 0.0, %v460_v11 }
  0xc1   : > { %v462_v12 = vsub.f32 %v434_v10, %v461_v5 }
  0xc3   : > { %v464_v15 = vmul.f32 %v462_v12, %v462_v12 }
  0xc5   : > { %v466_v6 = vadd.f32 %v465_v14, %v464_v15 }
  0xc7   : > { %814 = vrsqrt.f32 %v466_v6  ;;  %vm469_vm6 = vcmp.eq.f32.partialorder %v466_v6, inf  ;;  %v472_v18 = vand.u32 2147483648, %v466_v6  ;;  %vm471_vm7 = vcmp.eq.f32.partialorder %v466_v6, 0.0 }
  0xc8   : > { %816 = vrcp.f32 %v490_v24 }
  0xc9   : > { %818 = vlog2.f32 %v490_v24 }
  0xd1   : > { %v815_v17 = vpop.eup %814 }
  0xd2   : > { %v468_v19 = vmul.f32 %v815_v17, %v466_v6  ;;  %v817_v28 = vpop.eup %816 }
  0xd3   : > { %v819_v29 = vpop.eup %818  ;;  %v501_v33 = vmul.f32 0.5, %v817_v28 }
  0xd4   : > { %v470_v13 = vsel %vm469_vm6, %v466_v6, %v468_v19  ;;  %v504_v34 = vmul.f32 0.6931472, %v819_v29 }
  0xd5   : > { %v473_v20 = vsel %vm471_vm7, %v472_v18, %v470_v13  ;;  %v502_v35 = vmul.f32 %v501_v33, %v500_v32 }
  0xd6   : > { %v475_v21 = vsub.f32 %v473_v20, %v474_v23  ;;  %v505_v36 = vmul.f32 0.5, %v504_v34 }
  0xd8   : > { %v715_v25 = vmul.f32 -10.0, %v475_v21  ;;  %v506_v37 = vadd.f32 %v505_v36, %v502_v35 }
  0xda   : > { %v478_v27 = vmul.f32 1.442695, %v715_v25 }
  0xdc   : > { %820 = vpow2.f32 %v478_v27 }
  0xe6   : > { %v821_v30 = vpop.eup %820 }
  0xe7   : > { %v480_v31 = vadd.f32 1.0, %v821_v30 }
  0xe9   : > { %822 = vrcp.f32 %v480_v31 }
  0xf2   : > { %515 = sbr.rel (%p718_p0) target bundleno = 254 (0xfe), region = 64 }
  0xf3   : > { %v823_v39 = vpop.eup %822 }
  0xf4   : > { %v507_v41 = vsub.f32 1.0, %v823_v39  ;;  %v509_v42 = vmul.f32 %v823_v39, %v506_v37 }
  0xf6   : > { %v508_v43 = vmul.f32 %v507_v41, %v406_v38 }
  0xf8   : > { %v510_v44 = vadd.f32 %v509_v42, %v508_v43 }
  0xfa   : > { %v527_v51 = vsel %vm526_vm8, %v510_v44, 0.0 }
  0xfb   : > { %v528_v52 = vadd.f32 %v527_v51, %v525_v26 }
  0xfd   : > { %529 = vst [vmem:[%s1333_s0] sm:$0xff] %v528_v52 }
  0xfe PF: > { %p720_p1 = scmp.ge.s32.totalorder %s1026_s23, 0 }
 0x100   : > { %533 = sbr.rel (%p720_p1) target bundleno = 264 (0x108), region = 68 }
 0x104   : > { %v534_v53 = vld [vmem:[%s1333_s0] sm:$0xff] (!%p720_p1) }
 0x105   : > { %v535_v54 = vadd.f32 (!%p720_p1), %v534_v53, %v510_v44 }
 0x107   : > { %536 = vst [vmem:[%s1333_s0] sm:$0xff] %v535_v54 }
 0x108 PF: > { %s722_s19 = sshll.u32 %s1026_s23, 7  ;;  %s551_s10 = sshll.u32 %s1333_s0, 4  ;;  %s552_s10 = int_to_ptr.vmem [resolvable:$true] %s551_s10 }
 0x109   : > { %s1400_s12 = scalar_lea.hbm %s1449_s5, %s722_s19  ;;  %s538_s2 = scalar_lea.sflag [#allocation5], %s1310_s29 }
 0x10a   : > { %s944_s18 = scalar_lea.vmem %s552_s10, 128  ;;  %p1484_p13 = scmp.ne.s32.totalorder %s1469_s7, 0 }
 0x10b   : > { %p945_p10 = scmp.ne.s32.totalorder %s552_s10, %s944_s18  ;;  %s1044_s16 = smov [#allocation11]  }
 0x10c   : > { %s948_s8 = sshll.u32 %s1044_s16, 4  ;;  %s949_s8 = int_to_ptr.vmem [resolvable:$false] %s948_s8 }
 0x10d   : > { %p946_p11 = pnand %p945_p10, %p1484_p13  ;;  %s950_s24 = scalar_lea.vmem %s949_s8, 256 }
 0x10e   : > { %p951_p4 = scmp.lt.s32.totalorder %s552_s10, %s949_s8  ;;  %p952_p6 = scmp.lt.s32.totalorder %s950_s24, %s944_s18 }
 0x10f   : > { %p947_p5 = pneg %p946_p11 }
 0x110   : > { %p953_p2 = por %p952_p6, %p951_p4 }
 0x112   : > { %p954_p7 = pnand %p953_p2, %p947_p5 }
 0x114   : > { %957 = shalt.err (!%p954_p7)
}
 0x115   : > { %s958_s23 = scalar_lea.hbm %s1400_s12, 128  ;;  %s962_s13 = scalar_lea.hbm %s1449_s5, 256 }
 0x116   : > { %p959_p9 = scmp.ne.s32.totalorder %s1400_s12, %s958_s23  ;;  %p963_p3 = scmp.lt.u32.totalorder %s1400_s12, %s1449_s5 }
 0x117   : > { %p964_p0 = scmp.lt.u32.totalorder %s962_s13, %s958_s23  ;;  %p966_p10 = scmp.lt.u32.totalorder %s958_s23, %s1400_s12 }
 0x118   : > { %p960_p12 = pnand %p959_p9, %p1484_p13 }
 0x119   : > { %p965_p1 = por %p964_p0, %p963_p3 }
 0x11a   : > { %p961_p8 = pneg %p960_p12 }
 0x11b   : > { %p967_p11 = por %p966_p10, %p965_p1 }
 0x11d   : > { %p968_p5 = pnand %p967_p11, %p961_p8 }
 0x11f   : > { %971 = shalt.err (!%p968_p5)
}
 0x120   : > { %737 = dma.vmem_to_hbm [thread:$0]  (%p1484_p13), %s552_s10, 128, %s1400_s12, %s538_s2  }
 0x121 PF: > { %s563_s17 = sand.u32 1, %s1014_s20   ;;  %p1485_p4 = scmp.ne.s32.totalorder %s1471_s9, 0 }
 0x122   : > { %p1486_p6 = scmp.ge.s32.totalorder %s1034_s25, 2  ;;  %s564_s11 = scalar_lea.sflag [#allocation5], %s563_s17 }
 0x124   : > { %p753_p2 = pnand %p1486_p6, %p1485_p4 }
 0x126   : > { %1009 = dma.done.wait (!%p753_p2), %s564_s11, 128  }
 0x127   : > { %1011 = vsyncadd (!%p753_p2), %s564_s11, 4294967168  ;;  %s28_s25 = sadd.s32 1, %s1034_s25   ;;  %s1487_s22 = sld [smem:[#allocation16_spill]] }
 0x128   : > { %p25_p7 = scmp.ge.s32.totalorder %s28_s25, 4   ;;  %s1488_s28 = sld [smem:[#allocation19_spill]] }
 0x129   : > { %s1489_s23 = sld [smem:[#allocation17_spill]]  ;;  %s1490_s24 = sld [smem:[#allocation18_spill]] }
 0x12a   : > { %s1491_s20 = smov %s1018_s21  ;;  %27 = sbr.rel (!%p25_p7) target bundleno = 14 (0xe), region = 140 }
 0x12d   : > { %s1492_s21 = smov %s1487_s22 }
 0x12e   : > { %s1493_s22 = smov %s1488_s28 }
 0x131   :  { %569 = vsyncpa [#allocation4], 1 }
 0x132   :  { %571 = vsyncpa [#allocation4 + $0x1], 1 }
 0x133   :  { %572 = vsyncpa [#allocation7], 1 }
 0x134   :  { %574 = vsyncpa [#allocation7 + $0x1], 1 }
 0x135   :  { %575 = vsyncpa [#allocation10], 1 }
 0x136   :  { %577 = vsyncpa [#allocation10 + $0x1], 1 }
 0x137   :  { %578 = vsyncpa [#allocation5], 1 }
 0x138   :  { %580 = vsyncpa [#allocation5 + $0x1], 1 }

</bundles_post_ra>
